<compile_context>
chip_gen: v7x
topology: tpu7x:2x2x1
jax: 0.10.0
libtpu: 0.0.40
codegen_flags: <defaults>
</compile_context>

<pallas_src>
import functools

import jax
import jax.numpy as jnp
from jax import lax
from jax.experimental import pallas as pl
from jax.experimental.pallas import tpu as pltpu  # noqa: F401  (TPU backend)


# --------------------------------------------------------------------------
# Fused Pallas kernel (gridless, everything VMEM-resident, one launch)
# --------------------------------------------------------------------------

def _small_k_matmul(x, w):
    """x @ w as a sum of rank-1 outer products on the VPU.

    Used when the contraction dim K is far below MXU width (K = in_dim = 2
    here); a K=2 matmul would waste the systolic array and still pay MXU
    push/pop latency.
    """
    k = w.shape[0]
    if k > 8:  # large K: let the MXU handle it
        return jnp.dot(x, w, preferred_element_type=jnp.float32)
    acc = x[:, 0:1] * w[0:1, :]
    for i in range(1, k):
        acc = acc + x[:, i:i + 1] * w[i:i + 1, :]
    return acc


def _make_fused_kernel(hidden_dim, hid_w, head_mid, ctrl_dim, slab_w):
    used_w = hid_w + 2 + ctrl_dim

    def kernel(x_ref, coef_ref, w1_ref, w2_ref, wa_ref, wb_ref, gw_ref,
               bias_ref, out_ref):
        rows = x_ref.shape[0]
        # unpack the pre-packed bias tile (one DMA carries all 5 bias vectors)
        b1 = bias_ref[0:1, 0:hidden_dim]
        b2 = bias_ref[1:2, 0:hid_w]
        ba = bias_ref[2:3, 0:head_mid]
        bb = bias_ref[3:4, 0:2]
        gb = bias_ref[4:5, 0:ctrl_dim]

        # ---- InputToHidden: Linear(in->H) -> ReLU -> Linear(H -> H*hist) ----
        x = x_ref[...]                                           # (BN, in_dim)
        h = jnp.maximum(_small_k_matmul(x, w1_ref[...]) + b1, 0.0)   # VPU (K=2)
        hid = jnp.dot(h, w2_ref[...],
                      preferred_element_type=jnp.float32) + b2   # (BN, hist*H)
        out_ref[:, 0:hid_w] = hid.astype(out_ref.dtype)

        # ---- fused regress|pred heads on the UNIQUE rows only ----
        # w2 columns were permuted at prepare time so y0 sits at lane offset 0.
        y0 = hid[:, 0:hidden_dim]
        hh = jnp.maximum(
            jnp.dot(y0, wa_ref[...], preferred_element_type=jnp.float32) + ba,
            0.0)
        heads = jnp.dot(hh, wb_ref[...],
                        preferred_element_type=jnp.float32) + bb  # (BN, 2)
        out_ref[:, hid_w:hid_w + 2] = heads.astype(out_ref.dtype)

        # ---- fake control: self.get_control (single Linear) ----
        ctrl = jnp.dot(coef_ref[...], gw_ref[...],
                       preferred_element_type=jnp.float32) + gb
        out_ref[:, hid_w + 2:used_w] = ctrl.astype(out_ref.dtype)

        if used_w < slab_w:  # zero the lane padding of the slab
            out_ref[:, used_w:slab_w] = jnp.zeros(
                (rows, slab_w - used_w), out_ref.dtype)

    return kernel


def flownde_fused(prep, x2d, coef2d, *, hidden_dim, hid_w, head_mid, ctrl_dim):
    """Single gridless pallas_call producing one lane-dense (BN, slab_w) slab."""
    BN = x2d.shape[0]
    used_w = hid_w + 2 + ctrl_dim
    slab_w = max(128, ((used_w + 127) // 128) * 128)
    kernel = _make_fused_kernel(hidden_dim, hid_w, head_mid, ctrl_dim, slab_w)
    return pl.pallas_call(
        kernel,
        out_shape=jax.ShapeDtypeStruct((BN, slab_w), x2d.dtype),
    )(x2d, coef2d, prep["w1"], prep["w2"], prep["wa"], prep["wb"],
      prep["gw"], prep["bias"])


# --------------------------------------------------------------------------
# Semantic adjacency — parameter-only, hoisted out of the per-call kernel
# --------------------------------------------------------------------------

def _semantic_kernel(emb_ref, sem_ref):
    e = emb_ref[...]                                          # (N, H)
    s = lax.dot_general(e, e, (((1,), (1,)), ((), ())),       # E @ E^T, no .T
                        preferred_element_type=jnp.float32)
    s = jnp.maximum(s, 0.0)
    p = jnp.exp(s - jnp.max(s, axis=1, keepdims=True))
    sem_ref[...] = (p / jnp.sum(p, axis=1, keepdims=True)).astype(sem_ref.dtype)


def semantic_adjacency(node_embeddings):
    """softmax(relu(E @ E^T), axis=1): depends only on parameters, so it is
    computed ONCE (one-shot pallas_call) and reused across forward calls."""
    N = node_embeddings.shape[0]
    return pl.pallas_call(
        _semantic_kernel,
        out_shape=jax.ShapeDtypeStruct((N, N), node_embeddings.dtype),
    )(node_embeddings)


# --------------------------------------------------------------------------
# Deterministic parameter initialization (shapes follow Flownde.__init__)
# --------------------------------------------------------------------------

def init_params(key, num_node, in_dim, hidden_dim, out_dim, step_size, back):
    hist_length = int(back / step_size)
    ctrl = (out_dim - 1) * in_dim * 4

    def lin(kw, kb, din, dout):
        lim = (6.0 / (din + dout)) ** 0.5
        w = jax.random.uniform(kw, (din, dout), jnp.float32, -lim, lim)
        b = jax.random.uniform(kb, (dout,), jnp.float32, -lim, lim)
        return w, b

    keys = jax.random.split(key, 15)
    w1, b1 = lin(keys[0], keys[1], in_dim, hidden_dim)
    w2, b2 = lin(keys[2], keys[3], hidden_dim, hidden_dim * hist_length)
    rw1, rb1 = lin(keys[4], keys[5], hidden_dim, hidden_dim // 2)
    rw2, rb2 = lin(keys[6], keys[7], hidden_dim // 2, 1)
    pw1, pb1 = lin(keys[8], keys[9], hidden_dim, hidden_dim // 2)
    pw2, pb2 = lin(keys[10], keys[11], hidden_dim // 2, 1)
    gw, gb = lin(keys[12], keys[13], ctrl, ctrl)
    node_emb = jax.random.uniform(keys[14], (num_node, hidden_dim), jnp.float32)
    # NOTE: nn.BatchNorm2d / pred_one_step / adj are defined in __init__ but
    # never used on the forward path exercised here.
    return {
        "tohidden": (w1, b1, w2, b2),       # InputToHidden.tohidden
        "regress": (rw1, rb1, rw2, rb2),    # self.regress
        "pred": (pw1, pb1, pw2, pb2),       # self.pred
        "get_control": (gw, gb),            # self.get_control
        "node_embeddings": node_emb,        # self.node_embeddings
    }


# --------------------------------------------------------------------------
# One-time parameter preparation (head fusion, bias packing, column permute)
# --------------------------------------------------------------------------

def prepare_params(params, *, in_dim, hidden_dim, out_dim, step_size, back):
    hist_length = int(back / step_size)
    H = hidden_dim
    Hh = H // 2
    hid_w = hist_length * H
    pred_uses_y0 = (hist_length - 1) < back

    w1, b1, w2, b2 = params["tohidden"]
    rw1, rb1, rw2, rb2 = params["regress"]
    pw1, pb1, pw2, pb2 = params["pred"]
    gw, gb = params["get_control"]
    ctrl_dim = gw.shape[1]

    # Put the last-history block (y0) at lane offset 0 of hid — free slice in
    # the kernel; the wrapper undoes this with a jnp.roll over history blocks.
    perm = jnp.concatenate([
        jnp.arange((hist_length - 1) * H, hist_length * H),
        jnp.arange(0, (hist_length - 1) * H)])
    w2p, b2p = w2[:, perm], b2[perm]

    # Fuse regress + pred into one matmul chain.
    if pred_uses_y0:
        wa = jnp.concatenate([rw1, pw1], axis=1)                  # (H, H)
        ba = jnp.concatenate([rb1, pb1])
        wb = jnp.zeros((H, 2), jnp.float32)
        wb = wb.at[:Hh, 0:1].set(rw2).at[Hh:, 1:2].set(pw2)       # block-diag
        bb = jnp.concatenate([rb2, pb2])
    else:
        # pred's DDE input degenerates to zeros -> pred output is a constant;
        # fold it into the fused-head bias (no zero-input matmuls).
        pred_const = jnp.maximum(pb1, 0.0) @ pw2 + pb2            # (1,)
        wa, ba = rw1, rb1                                         # (H, H/2)
        wb = jnp.concatenate([rw2, jnp.zeros_like(rw2)], axis=1)  # (H/2, 2)
        bb = jnp.concatenate([rb2, pred_const])
    head_mid = wa.shape[1]

    # Pack all 5 bias vectors into ONE (8, 128) tile: one DMA, one VMEM tile.
    assert max(H, hid_w, head_mid, 2, ctrl_dim) <= 128, "bias pack overflow"
    bias = jnp.zeros((8, 128), jnp.float32)
    bias = bias.at[0, :H].set(b1)
    bias = bias.at[1, :hid_w].set(b2p)
    bias = bias.at[2, :head_mid].set(ba)
    bias = bias.at[3, :2].set(bb)
    bias = bias.at[4, :ctrl_dim].set(gb)

    return {"w1": w1, "w2": w2p, "wa": wa, "wb": wb, "gw": gw, "bias": bias}


# --------------------------------------------------------------------------
# Flownde forward (eval mode)
# --------------------------------------------------------------------------

def flownde_forward(prep, semantic_A, initial_state, coeffs, *, hidden_dim,
                    out_dim, step_size, back):
    B, N, in_dim = initial_state.shape
    hist_length = int(back / step_size)
    H = hidden_dim
    hid_w = hist_length * H
    ctrl_dim = (out_dim - 1) * in_dim * 4
    pred_uses_y0 = (hist_length - 1) < back
    head_mid = H if pred_uses_y0 else H // 2
    T = 12  # torch.arange(12) + back

    # ---- flatten inputs for the fused kernel ----
    x2d = initial_state.reshape(B * N, in_dim)
    coeffs_st = jnp.stack(coeffs, axis=-1)                    # (B,N,out-1,in,4)
    coef2d = coeffs_st.reshape(B * N, ctrl_dim)

    slab = flownde_fused(prep, x2d, coef2d, hidden_dim=H, hid_w=hid_w,
                         head_mid=head_mid, ctrl_dim=ctrl_dim)
    hid2d = slab[:, 0:hid_w]
    heads = slab[:, hid_w:hid_w + 2]
    fc2d = slab[:, hid_w + 2:hid_w + 2 + ctrl_dim]

    # ---- InputToHidden reshape / permute(1,2,0,3) glue (undo column perm) ----
    hidden = hid2d.reshape(B, N, hist_length, H)
    hidden = jnp.roll(hidden, shift=-1, axis=2)       # undo [last|rest] packing
    hist_hidden = jnp.transpose(hidden, (1, 2, 0, 3))            # (N, hist, B, H)

    # ---- hidden_state = cat([hist_hidden, zeros], dim=1) ----
    fur_length = int(out_dim / step_size)
    fur_hidden = jnp.zeros((N, fur_length, B, H), jnp.float32)
    hidden_state = jnp.concatenate([hist_hidden, fur_hidden], axis=1)

    # TODO(synk): DDEBlock (dgl message passing + delay-DE integration driven by
    # controldiffeq.NaturalCubicSpline.derivative) is not provided / has no clean
    # Pallas equivalent; the stand-in broadcasts y0 across the 12 query times, so
    # the regress/pred heads are evaluated once per unique (B*N) row inside the
    # kernel and only the scalar results are broadcast to T=12 here.
    reg_bn = heads[:, 0].reshape(B, N)                           # (B, N)
    regression = jnp.broadcast_to(reg_bn.T[None], (T, N, B))     # (T, N, B)
    # TODO(synk): smooth_l1 regression loss against spline.evaluate(times[i])
    # targets is skipped (cubic spline unavailable; only used in training).

    pred_bn = heads[:, 1].reshape(B, N)                          # (B, N)
    y_pred = jnp.broadcast_to(pred_bn[:, :, None], (B, N, T))    # (B, N, 12)

    # ---- fake control: self.get_control output reshaped back ----
    fake_control_full = fc2d.reshape(B, N, out_dim - 1, in_dim, 4)
    fake_control = tuple(fake_control_full[..., i] for i in range(4))

    # eval mode: PyTorch returns y_pred only; extras returned for inspection.
    return y_pred, regression, semantic_A, hidden_state, fake_control


# --------------------------------------------------------------------------
if __name__ == "__main__":
    B, N = 2, 16
    in_dim, hidden_dim, out_dim = 2, 32, 12
    step_size, back = 1, 2

    key = jax.random.PRNGKey(0)
    k_params, k_state, k_coef = jax.random.split(key, 3)
    params = init_params(k_params, N, in_dim, hidden_dim, out_dim,
                         step_size, back)

    # One-time prep: head fusion, bias packing, w2 column permutation.
    prep = prepare_params(params, in_dim=in_dim, hidden_dim=hidden_dim,
                          out_dim=out_dim, step_size=step_size, back=back)
    # Parameter-only semantic adjacency: computed once, reused every forward.
    sem_A = semantic_adjacency(params["node_embeddings"])

    # initial_state stands in for spline.evaluate(times[0])
    # TODO(synk): NaturalCubicSpline evaluation itself is not translated.
    initial_state = jax.random.normal(k_state, (B, N, in_dim), jnp.float32)
    ck = jax.random.split(k_coef, 4)
    coeffs = tuple(
        jax.random.normal(ck[i], (B, N, out_dim - 1, in_dim), jnp.float32)
        for i in range(4)
    )

    fwd = jax.jit(functools.partial(
        flownde_forward, hidden_dim=hidden_dim, out_dim=out_dim,
        step_size=step_size, back=back))
    outs = fwd(prep, sem_A, initial_state, coeffs)
    outs = jax.block_until_ready(outs)

    y_pred = outs[0]
    assert y_pred.shape == (B, N, 12), y_pred.shape
    assert outs[1].shape == (12, N, B)
    assert outs[2].shape == (N, N)
    assert outs[3].shape == (N, int(back / step_size) + int(out_dim / step_size),
                             B, hidden_dim)
    print("KERNEL_OK")
</pallas_src>

<mosaic_0001>
module attributes {stable_mosaic.version = 11 : i64} {
  func.func @_semantic_kernel(%arg0: memref<16x32xf32, #tpu.memory_space<vmem>>, %arg1: memref<16x16xf32, #tpu.memory_space<vmem>>) attributes {dimension_semantics = [], scalar_prefetch = 0 : i64, scratch_operands = 0 : i64, tpu.core_type = #tpu.core_type<tc>} {
    %c0 = arith.constant 0 : index
    %c0_0 = arith.constant 0 : index
    %0 = vector.load %arg0[%c0, %c0_0] : memref<16x32xf32, #tpu.memory_space<vmem>>, vector<16x32xf32>
    %cst = arith.constant dense<0.000000e+00> : vector<16x16xf32>
    %1 = tpu.matmul %0, %0, %cst {dimension_numbers = #tpu.dot_dimension_numbers<[1], [1], [0], [0], [0, 0, 1, 0], [], []>} : vector<16x32xf32>, vector<16x32xf32>, vector<16x16xf32> -> vector<16x16xf32>
    %cst_1 = arith.constant 0.000000e+00 : f32
    %2 = vector.broadcast %cst_1 : f32 to vector<16x16xf32>
    %3 = arith.maximumf %1, %2 : vector<16x16xf32>
    %cst_2 = arith.constant dense<0xFF800000> : vector<16xf32>
    %4 = vector.multi_reduction <maximumf>, %3, %cst_2 [1] : vector<16x16xf32> to vector<16xf32>
    %5 = vector.shape_cast %4 : vector<16xf32> to vector<16x1xf32>
    %6 = vector.broadcast %5 : vector<16x1xf32> to vector<16x16xf32>
    %7 = arith.subf %3, %6 : vector<16x16xf32>
    %8 = math.exp %7 : vector<16x16xf32>
    %cst_3 = arith.constant dense<0.000000e+00> : vector<16xf32>
    %9 = vector.multi_reduction <add>, %8, %cst_3 [1] : vector<16x16xf32> to vector<16xf32>
    %10 = vector.shape_cast %9 : vector<16xf32> to vector<16x1xf32>
    %11 = vector.broadcast %10 : vector<16x1xf32> to vector<16x16xf32>
    %12 = arith.divf %8, %11 : vector<16x16xf32>
    %c0_4 = arith.constant 0 : index
    %c0_5 = arith.constant 0 : index
    %13 = vector.load %arg1[%c0_4, %c0_5] : memref<16x16xf32, #tpu.memory_space<vmem>>, vector<16x16xf32>
    tpu.vector_store %arg1[%c0_4, %c0_5], %12 {strides = array<i32>} : memref<16x16xf32, #tpu.memory_space<vmem>>, vector<16x16xf32>,
    return
  }
}

</mosaic_0001>

<bundles_post_ra>
// kernel: tpu_custom_call.1
= control target key start
LH: loop header
LB: loop body
LE: loop exit
PB: predicated region body
PF: predicated region fallthrough
CT: control target
= control target key end

     0   :  { %6 = vsyncpa [#allocation3], 0  ;;  %s282_s0 = inlined_call_operand.hbm [shape: f32[16,32], index: 0, kind: input, shape index: {}]   ;;  %s283_s1 = inlined_call_operand.hbm [shape: f32[16,16], index: 1, kind: output, shape index: {}]  }
   0x1   :  { %7 = vsyncpa [#allocation4], 0  ;;  %s232_s6 = smov [#allocation2]   ;;  %s184_s10 = scalar_lea.hbm %s282_s0, 256 }
   0x2   :  { %s13_s7 = sshll.u32 %s232_s6, 4  ;;  %p185_p0 = scmp.ne.s32.totalorder %s282_s0, %s184_s10  ;;  %s14_s7 = int_to_ptr.vmem [resolvable:$true] %s13_s7 }
   0x3   :  { %p188_p1 = scmp.lt.u32.totalorder %s184_s10, %s282_s0 }
   0x5   :  { %p190_p2 = pnand %p188_p1, %p185_p0 }
   0x7   :  { %193 = shalt.err (!%p190_p2)
}
   0x8   :  { %s194_s15 = scalar_lea.vmem %s14_s7, 256  ;;  %p199_p4 = scmp.lt.s32.totalorder %s14_s7, %s14_s7 }
   0x9   :  { %p195_p3 = scmp.ne.s32.totalorder %s14_s7, %s194_s15  ;;  %p200_p5 = scmp.lt.s32.totalorder %s194_s15, %s194_s15 }
   0xb   :  { %p201_p6 = por %p200_p5, %p199_p4 }
   0xd   :  { %p202_p7 = pnand %p201_p6, %p195_p3 }
   0xf   :  { %205 = shalt.err (!%p202_p7)
}
  0x10   :  { %s233_s16 = smov 128   ;;  %s234_s17 = smov 8  }
  0x11   :  { %19 = dma.hbm_to_vmem [thread:$0]  %s282_s0, 256, %s14_s7, [#allocation3], %s233_s16, %s233_s16, %s234_s17  }
  0x12   :  { %228 = dma.done.wait [#allocation3], 256  }
  0x13   :  { %229 = vsyncadd [#allocation3], 4294967040  ;;  %vm25_vm0 = vcmask 261120   ;;  %v23_v0 = vld [vmem:[#allocation2] sm:$0xff]  ;;  %v24_v1 = vld [vmem:[#allocation2 + $0x8] sm:$0xff]  ;;  %vm109_vm2 = vcmask 130048  }
  0x14   :  { %vm167_vm1 = vmpackc.low %vm25_vm0, %vm25_vm0  ;;  %v166_v2 = vpack.c.bf16 %v24_v1, %v23_v0  ;;  %163 = vmatprep.mubr.msk.f32.mxu0 %vm25_vm0, %v23_v0  ;;  %s235_s0 = smov [#allocation5]  }
  0x15   :  { %s139_s20 = sshll.u32 %s235_s0, 4  ;;  %s140_s20 = int_to_ptr.vmem [resolvable:$true] %s139_s20 }
  0x16   :  { %168 = vmatprep.subr.msk.bf16.mxu0 %vm167_vm1, %v166_v2  ;;  %s206_s21 = scalar_lea.vmem %s140_s20, 256  ;;  %p211_p9 = scmp.lt.s32.totalorder %s140_s20, %s140_s20 }
  0x17   :  { %171 = vmatpush3.bf16.xpose.msk.msra.mxu0 %vm167_vm1, %v166_v2  ;;  %p207_p8 = scmp.ne.s32.totalorder %s140_s20, %s206_s21  ;;  %p212_p10 = scmp.lt.s32.totalorder %s206_s21, %s206_s21 }
  0x19   :  { %p213_p11 = por %p212_p10, %p211_p9 }
  0x1b   :  { %p214_p12 = pnand %p213_p11, %p207_p8 }
  0x1e   :  { %164 = vmatmul.mubr.msk.f32.vlgmr.msra.gmra.mrb[0].mxu0 %vm25_vm0, %v24_v1 }
  0xf1   :  { %v165_v3 = vpop.f32.mrb[0].mxu0 }
  0xf2   :  { %v98_v4 = vpop.f32.mrb[1].mxu0  ;;  %v108_v6 = vmax.f32 %v165_v3, 0.0 }
  0xf3   :  { %v107_v5 = vmax.f32 %v98_v4, 0.0 }
  0xf4   :  { %v113_v8 = vsel %vm109_vm2, %v108_v6, -inf }
  0xf5   :  { %v110_v7 = vsel %vm109_vm2, %v107_v5, -inf }
  0xf6   :  { %111 = vmax.xlane.f32.xlu0 %v110_v7 }
  0xfa   :  { %114 = vmax.xlane.f32.xlu0 %v113_v8 }
 0x183   :  { %v112_v9 = vpop.xlane.xlu0 %111 }
 0x184   :  { %v116_v10 = vsub.f32 %v107_v5, %v112_v9 }
 0x186   :  { %v118_v11 = vmul.f32 1.442695, %v116_v10 }
 0x187   :  { %v115_v12 = vpop.xlane.xlu0 %114 }
 0x188   :  { %176 = vpow2.f32 %v118_v11  ;;  %v117_v13 = vsub.f32 %v108_v6, %v115_v12 }
 0x18a   :  { %v120_v14 = vmul.f32 1.442695, %v117_v13 }
 0x18c   :  { %178 = vpow2.f32 %v120_v14 }
 0x192   :  { %v177_v15 = vpop.eup %176 }
 0x193   :  { %v122_v16 = vsel %vm109_vm2, %v177_v15, 0.0 }
 0x194   :  { %123 = vadd.xlane.f32.xlu1 %v122_v16 }
 0x196   :  { %v179_v17 = vpop.eup %178 }
 0x197   :  { %v125_v18 = vsel %vm109_vm2, %v179_v17, 0.0 }
 0x198   :  { %126 = vadd.xlane.f32.xlu1 %v125_v18 }
 0x221   :  { %v124_v19 = vpop.xlane.xlu1 %123 }
 0x222   :  { %180 = vrcp.f32 %v124_v19 }
 0x225   :  { %v127_v20 = vpop.xlane.xlu1 %126 }
 0x226   :  { %182 = vrcp.f32 %v127_v20 }
 0x22c   :  { %v181_v21 = vpop.eup %180 }
 0x22d   :  { %v129_v22 = vmul.f32 %v181_v21, %v177_v15 }
 0x22f   :  { %132 = vst.msk [vmem:[#allocation5] sm:$0xff] %vm109_vm2, %v129_v22 }
 0x230   :  { %v183_v23 = vpop.eup %182 }
 0x231   :  { %v131_v24 = vmul.f32 %v183_v23, %v179_v17 }
 0x233   :  { %133 = vst.msk [vmem:[#allocation5 + $0x8] sm:$0xff] %vm109_vm2, %v131_v24 }
 0x234   :  { %217 = shalt.err (!%p214_p12)
}
 0x235   :  { %s218_s24 = scalar_lea.hbm %s283_s1, 256 }
 0x236   :  { %p219_p13 = scmp.ne.s32.totalorder %s283_s1, %s218_s24  ;;  %p222_p0 = scmp.lt.u32.totalorder %s218_s24, %s283_s1 }
 0x238   :  { %p224_p1 = pnand %p222_p0, %p219_p13 }
 0x23a   :  { %227 = shalt.err (!%p224_p1)
}
 0x23b   :  { %145 = dma.vmem_to_hbm [thread:$0]  %s140_s20, 256, %s283_s1, [#allocation4], %s233_s16, %s233_s16, %s234_s17  }
 0x23c   :  { %230 = dma.done.wait [#allocation4], 256  }
 0x23d   :  { %231 = vsyncadd [#allocation4], 4294967040 }
 0x23e   :  { %149 = vsyncpa [#allocation3], 1 }
 0x23f   :  { %150 = vsyncpa [#allocation4], 1 }

</bundles_post_ra>
